<compile_context>
chip_gen: v6e
topology: v6e:2x2x1
jax: 0.10.0
libtpu: 0.0.40
codegen_flags: <defaults>
</compile_context>

<pallas_src>
import jax
import jax.numpy as jnp
from jax.experimental import pallas as pl
from jax.experimental.pallas import tpu as pltpu


def _cond_deconv_kernel(x_ref, wr_ref, br_ref, wstk_ref, bstk_ref, o_ref):
    # x_ref    : (N, Cin, H*W)       bf16  channels on sublanes, pixels on lanes (dense)
    # wr_ref   : (Cin, 3)            f32   routing Linear weight, transposed
    # br_ref   : (1, 3)              f32   routing Linear bias
    # wstk_ref : (3, Cout*k*k, Cin)  bf16  three deconv weights, rows = (co, kh, kw)
    # bstk_ref : (3, Cout*k*k, 1)    f32   three deconv biases, tiled over (kh, kw)
    # o_ref    : (N, Cout*k*k, H*W)  f32   per-tap output planes (lane-dense store)
    n_batch = x_ref.shape[0]
    hw = x_ref.shape[2]

    # ---- routing: sigmoid(Linear(mean_{H,W}(x[0])))  — batch 0 only, per the module.
    x0 = x_ref[0].astype(jnp.float32)                       # (Cin, HW)
    row_sum = jnp.sum(x0, axis=1, keepdims=True)            # (Cin, 1)   lane reduce (XLU)
    logits = (jnp.sum(wr_ref[...] * row_sum, axis=0, keepdims=True) * (1.0 / hw)
              + br_ref[...])                                # (1, 3)
    r = 1.0 / (1.0 + jnp.exp(-logits))                      # sigmoid (EUP), f32

    r0 = r[:, 0:1]
    r1 = r[:, 1:2]
    r2 = r[:, 2:3]                                          # (1, 1) each

    # ---- fold the three deconvs into one by linearity:  W = sum_k r_k W_k,  b likewise.
    w_comb = (wstk_ref[0].astype(jnp.float32) * r0
              + wstk_ref[1].astype(jnp.float32) * r1
              + wstk_ref[2].astype(jnp.float32) * r2)       # (Cout*k*k, Cin) f32
    w_comb = w_comb.astype(jnp.bfloat16)                    # native bf16 MXU operands
    b_comb = bstk_ref[0] * r0 + bstk_ref[1] * r1 + bstk_ref[2] * r2   # (Cout*k*k, 1) f32

    # ---- single MXU matmul per batch element, f32 accumulate, dense 256-lane store.
    for n in range(n_batch):                                # static, N is tiny
        acc = jnp.dot(w_comb, x_ref[n],
                      preferred_element_type=jnp.float32)   # (Cout*k*k, HW)
        o_ref[n] = (acc + b_comb).astype(o_ref.dtype)


def cond_deconv2d_forward(x_nchw, params, *, kernel_size, stride):
    """CondDeconv2D.forward.  x_nchw: (N, Cin, H, W) f32 -> (N, Cout, H*k, W*k) f32."""
    assert kernel_size == stride, "kernel currently requires kernel_size == stride"
    # TODO(synk): kernel_size != stride needs an overlap-add (or gap-fill) epilogue over taps.
    N, Cin, H, W = x_nchw.shape
    k = kernel_size
    Cout = params["w_deconv"][0].shape[1]
    HW = H * W
    BKK = Cout * k * k

    # --- operand packing (cheap layout plumbing on tiny tensors) ---------------------
    # NCHW -> (N, Cin, H*W): contiguous reshape, trailing dim lane-dense; bf16 halves DMA.
    x_pack = x_nchw.astype(jnp.bfloat16).reshape(N, Cin, HW)
    # ConvTranspose2d weight (Cin, Cout, k, k) -> rows indexed by (co, kh, kw).
    w_stack = jnp.stack([jnp.transpose(w, (1, 2, 3, 0)).reshape(BKK, Cin)
                         for w in params["w_deconv"]]).astype(jnp.bfloat16)   # (3,BKK,Cin)
    b_stack = jnp.stack([jnp.repeat(b, k * k) for b in params["b_deconv"]])
    b_stack = b_stack.reshape(3, BKK, 1).astype(jnp.float32)                  # (3,BKK,1)
    wr = jnp.transpose(params["w_route"]).astype(jnp.float32)                 # (Cin, 3)
    br = params["b_route"].reshape(1, 3).astype(jnp.float32)                  # (1, 3)

    # Single grid step: at this size per-step overhead dominates, everything fits VMEM.
    # At real U-Net sizes: add a ("parallel",) batch/row axis (even extent for v7x's 2 TCs)
    # and set vmem_limit_bytes so 2x(in tile)+2x(out tile)+weights stay under ~48 MiB.
    out_flat = pl.pallas_call(
        _cond_deconv_kernel,
        out_shape=jax.ShapeDtypeStruct((N, BKK, HW), jnp.float32),
        grid=(1,),
        in_specs=[
            pl.BlockSpec((N, Cin, HW), lambda i: (0, 0, 0)),
            pl.BlockSpec((Cin, 3), lambda i: (0, 0)),
            pl.BlockSpec((1, 3), lambda i: (0, 0)),
            pl.BlockSpec((3, BKK, Cin), lambda i: (0, 0, 0)),
            pl.BlockSpec((3, BKK, 1), lambda i: (0, 0, 0)),
        ],
        out_specs=pl.BlockSpec((N, BKK, HW), lambda i: (0, 0, 0)),
        compiler_params=pltpu.CompilerParams(dimension_semantics=("arbitrary",)),
    )(x_pack, wr, br, w_stack, b_stack)

    # pixel-shuffle the per-tap planes back to NCHW:
    #   out_flat[n, co*k*k + kh*k + kw, i*W + j] -> out[n, co, i*k + kh, j*k + kw]
    out = out_flat.reshape(N, Cout, k, k, H, W)
    out = jnp.transpose(out, (0, 1, 4, 2, 5, 3)).reshape(N, Cout, H * k, W * k)
    return out


# ---- plain-JAX reference (mirrors the PyTorch forward) ------------------------------
def _deconv_ref(x, w, b, k, d):
    N, Cin, H, W = x.shape
    Cout = w.shape[1]
    Hout, Wout = (H - 1) * d + k, (W - 1) * d + k
    out = jnp.zeros((N, Cout, Hout, Wout), jnp.float32) + b[None, :, None, None]
    for kh in range(k):
        for kw in range(k):
            contrib = jnp.einsum("nchw,co->nohw", x, w[:, :, kh, kw])
            out = out.at[:, :, kh:kh + H * d:d, kw:kw + W * d:d].add(contrib)
    return out


def cond_deconv2d_reference(x, params, *, kernel_size, stride):
    pooled = x.mean(axis=(2, 3))                                    # (N, Cin)
    logits = pooled @ params["w_route"].T + params["b_route"]       # (N, 3)
    r = jax.nn.sigmoid(logits)
    outs = [_deconv_ref(x, w, b, kernel_size, stride)
            for w, b in zip(params["w_deconv"], params["b_deconv"])]
    return r[0, 0] * outs[0] + r[0, 1] * outs[1] + r[0, 2] * outs[2]


def init_cond_deconv_params(key, in_ch, out_ch, k):
    ks = jax.random.split(key, 8)
    return {
        # Linear(in_ch, 3): weight (3, in_ch), bias (3,)
        "w_route": 0.3 * jax.random.normal(ks[0], (3, in_ch), jnp.float32),
        "b_route": 0.1 * jax.random.normal(ks[1], (3,), jnp.float32),
        # ConvTranspose2d(in_ch, out_ch, k, stride): weight (in, out, k, k), bias (out,)
        "w_deconv": [0.2 * jax.random.normal(ks[2 + i], (in_ch, out_ch, k, k), jnp.float32)
                     for i in range(3)],
        "b_deconv": [0.1 * jax.random.normal(ks[5 + i], (out_ch,), jnp.float32)
                     for i in range(3)],
    }


if __name__ == "__main__":
    key = jax.random.PRNGKey(0)
    k_x, k_p = jax.random.split(key)

    # CondDeconv2D(a, b, c, d): a=in_ch, b=out_ch, c=kernel, d=stride (canonical up-conv c==d)
    a, b, c, d = 4, 8, 2, 2
    N, H, W = 2, 16, 16
    x = jax.random.normal(k_x, (N, a, H, W), jnp.float32)
    params = init_cond_deconv_params(k_p, a, b, c)

    out = jax.block_until_ready(cond_deconv2d_forward(x, params, kernel_size=c, stride=d))
    assert out.shape == (N, b, (H - 1) * d + c, (W - 1) * d + c), out.shape

    # Reference in f32 on the same bf16-quantized operands the kernel consumes, so the
    # check isolates kernel math (bf16 matmul operands, f32 accumulate) from quantization.
    x_q = x.astype(jnp.bfloat16).astype(jnp.float32)
    params_q = dict(params)
    params_q["w_deconv"] = [w.astype(jnp.bfloat16).astype(jnp.float32)
                            for w in params["w_deconv"]]
    ref = jax.block_until_ready(
        cond_deconv2d_reference(x_q, params_q, kernel_size=c, stride=d))

    max_err = float(jnp.max(jnp.abs(out - ref)))
    assert jnp.allclose(out, ref, rtol=1e-2, atol=1e-2), max_err

    print("KERNEL_OK")
</pallas_src>

<mosaic_0001>
module attributes {stable_mosaic.version = 11 : i64} {
  func.func @_cond_deconv_kernel(%arg0: i32, %arg1: memref<2x4x256xbf16, #tpu.memory_space<vmem>>, %arg2: memref<4x3xf32, #tpu.memory_space<vmem>>, %arg3: memref<1x3xf32, #tpu.memory_space<vmem>>, %arg4: memref<3x32x4xbf16, #tpu.memory_space<vmem>>, %arg5: memref<3x32x1xf32, #tpu.memory_space<vmem>>, %arg6: memref<2x32x256xf32, #tpu.memory_space<vmem>>) attributes {dimension_semantics = [#tpu.dimension_semantics<arbitrary>], iteration_bounds = array<i64: 1>, scalar_prefetch = 0 : i64, scratch_operands = 0 : i64, tpu.core_type = #tpu.core_type<tc>, window_params = [{pipeline_mode = #tpu.pipeline_mode<synchronous>, transform_indices = @transform_0, window_bounds = array<i64: 2, 4, 256>}, {pipeline_mode = #tpu.pipeline_mode<synchronous>, transform_indices = @transform_1, window_bounds = array<i64: 4, 3>}, {pipeline_mode = #tpu.pipeline_mode<synchronous>, transform_indices = @transform_2, window_bounds = array<i64: 1, 3>}, {pipeline_mode = #tpu.pipeline_mode<synchronous>, transform_indices = @transform_3, window_bounds = array<i64: 3, 32, 4>}, {pipeline_mode = #tpu.pipeline_mode<synchronous>, transform_indices = @transform_4, window_bounds = array<i64: 3, 32, 1>}, {pipeline_mode = #tpu.pipeline_mode<synchronous>, transform_indices = @transform_5, window_bounds = array<i64: 2, 32, 256>}]} {
    %c0 = arith.constant 0 : index
    %c0_0 = arith.constant 0 : index
    %c0_1 = arith.constant 0 : index
    %0 = vector.load %arg1[%c0, %c0_0, %c0_1] : memref<2x4x256xbf16, #tpu.memory_space<vmem>>, vector<1x4x256xbf16>
    %1 = vector.shape_cast %0 : vector<1x4x256xbf16> to vector<4x256xbf16>
    %2 = arith.extf %1 : vector<4x256xbf16> to vector<4x256xf32>
    %cst = arith.constant dense<0.000000e+00> : vector<4xf32>
    %3 = vector.multi_reduction <add>, %2, %cst [1] : vector<4x256xf32> to vector<4xf32>
    %4 = vector.shape_cast %3 : vector<4xf32> to vector<4x1xf32>
    %c0_2 = arith.constant 0 : index
    %c0_3 = arith.constant 0 : index
    %5 = vector.load %arg2[%c0_2, %c0_3] : memref<4x3xf32, #tpu.memory_space<vmem>>, vector<4x3xf32>
    %6 = vector.broadcast %4 : vector<4x1xf32> to vector<4x3xf32>
    %7 = arith.mulf %5, %6 : vector<4x3xf32>
    %cst_4 = arith.constant dense<0.000000e+00> : vector<3xf32>
    %8 = vector.multi_reduction <add>, %7, %cst_4 [0] : vector<4x3xf32> to vector<3xf32>
    %9 = vector.shape_cast %8 : vector<3xf32> to vector<1x3xf32>
    %cst_5 = arith.constant 3.906250e-03 : f32
    %10 = vector.broadcast %cst_5 : f32 to vector<1x3xf32>
    %11 = arith.mulf %9, %10 : vector<1x3xf32>
    %c0_6 = arith.constant 0 : index
    %c0_7 = arith.constant 0 : index
    %12 = vector.load %arg3[%c0_6, %c0_7] : memref<1x3xf32, #tpu.memory_space<vmem>>, vector<1x3xf32>
    %13 = arith.addf %11, %12 : vector<1x3xf32>
    %cst_8 = arith.constant 0.000000e+00 : f32
    %14 = vector.broadcast %cst_8 : f32 to vector<1x3xf32>
    %15 = arith.subf %14, %13 : vector<1x3xf32>
    %16 = math.exp %15 : vector<1x3xf32>
    %cst_9 = arith.constant 1.000000e+00 : f32
    %17 = vector.broadcast %cst_9 : f32 to vector<1x3xf32>
    %18 = arith.addf %17, %16 : vector<1x3xf32>
    %cst_10 = arith.constant 1.000000e+00 : f32
    %19 = vector.broadcast %cst_10 : f32 to vector<1x3xf32>
    %20 = arith.divf %19, %18 : vector<1x3xf32>
    %21 = vector.extract_strided_slice %20 {offsets = [0, 0], sizes = [1, 1], strides = [1, 1]} : vector<1x3xf32> to vector<1x1xf32>
    %22 = vector.extract_strided_slice %20 {offsets = [0, 1], sizes = [1, 1], strides = [1, 1]} : vector<1x3xf32> to vector<1x1xf32>
    %23 = vector.extract_strided_slice %20 {offsets = [0, 2], sizes = [1, 1], strides = [1, 1]} : vector<1x3xf32> to vector<1x1xf32>
    %c0_11 = arith.constant 0 : index
    %c0_12 = arith.constant 0 : index
    %c0_13 = arith.constant 0 : index
    %24 = vector.load %arg4[%c0_11, %c0_12, %c0_13] : memref<3x32x4xbf16, #tpu.memory_space<vmem>>, vector<1x32x4xbf16>
    %25 = vector.shape_cast %24 : vector<1x32x4xbf16> to vector<32x4xbf16>
    %26 = arith.extf %25 : vector<32x4xbf16> to vector<32x4xf32>
    %27 = vector.broadcast %21 : vector<1x1xf32> to vector<32x4xf32>
    %28 = arith.mulf %26, %27 : vector<32x4xf32>
    %c1 = arith.constant 1 : index
    %c0_14 = arith.constant 0 : index
    %c0_15 = arith.constant 0 : index
    %29 = vector.load %arg4[%c1, %c0_14, %c0_15] : memref<3x32x4xbf16, #tpu.memory_space<vmem>>, vector<1x32x4xbf16>
    %30 = vector.shape_cast %29 : vector<1x32x4xbf16> to vector<32x4xbf16>
    %31 = arith.extf %30 : vector<32x4xbf16> to vector<32x4xf32>
    %32 = vector.broadcast %22 : vector<1x1xf32> to vector<32x4xf32>
    %33 = arith.mulf %31, %32 : vector<32x4xf32>
    %34 = arith.addf %28, %33 : vector<32x4xf32>
    %c2 = arith.constant 2 : index
    %c0_16 = arith.constant 0 : index
    %c0_17 = arith.constant 0 : index
    %35 = vector.load %arg4[%c2, %c0_16, %c0_17] : memref<3x32x4xbf16, #tpu.memory_space<vmem>>, vector<1x32x4xbf16>
    %36 = vector.shape_cast %35 : vector<1x32x4xbf16> to vector<32x4xbf16>
    %37 = arith.extf %36 : vector<32x4xbf16> to vector<32x4xf32>
    %38 = vector.broadcast %23 : vector<1x1xf32> to vector<32x4xf32>
    %39 = arith.mulf %37, %38 : vector<32x4xf32>
    %40 = arith.addf %34, %39 : vector<32x4xf32>
    %41 = arith.truncf %40 : vector<32x4xf32> to vector<32x4xbf16>
    %c0_18 = arith.constant 0 : index
    %c0_19 = arith.constant 0 : index
    %c0_20 = arith.constant 0 : index
    %42 = vector.load %arg5[%c0_18, %c0_19, %c0_20] : memref<3x32x1xf32, #tpu.memory_space<vmem>>, vector<1x32x1xf32>
    %43 = vector.shape_cast %42 : vector<1x32x1xf32> to vector<32x1xf32>
    %44 = vector.broadcast %21 : vector<1x1xf32> to vector<32x1xf32>
    %45 = arith.mulf %43, %44 : vector<32x1xf32>
    %c1_21 = arith.constant 1 : index
    %c0_22 = arith.constant 0 : index
    %c0_23 = arith.constant 0 : index
    %46 = vector.load %arg5[%c1_21, %c0_22, %c0_23] : memref<3x32x1xf32, #tpu.memory_space<vmem>>, vector<1x32x1xf32>
    %47 = vector.shape_cast %46 : vector<1x32x1xf32> to vector<32x1xf32>
    %48 = vector.broadcast %22 : vector<1x1xf32> to vector<32x1xf32>
    %49 = arith.mulf %47, %48 : vector<32x1xf32>
    %50 = arith.addf %45, %49 : vector<32x1xf32>
    %c2_24 = arith.constant 2 : index
    %c0_25 = arith.constant 0 : index
    %c0_26 = arith.constant 0 : index
    %51 = vector.load %arg5[%c2_24, %c0_25, %c0_26] : memref<3x32x1xf32, #tpu.memory_space<vmem>>, vector<1x32x1xf32>
    %52 = vector.shape_cast %51 : vector<1x32x1xf32> to vector<32x1xf32>
    %53 = vector.broadcast %23 : vector<1x1xf32> to vector<32x1xf32>
    %54 = arith.mulf %52, %53 : vector<32x1xf32>
    %55 = arith.addf %50, %54 : vector<32x1xf32>
    %c0_27 = arith.constant 0 : index
    %c0_28 = arith.constant 0 : index
    %c0_29 = arith.constant 0 : index
    %56 = vector.load %arg1[%c0_27, %c0_28, %c0_29] : memref<2x4x256xbf16, #tpu.memory_space<vmem>>, vector<1x4x256xbf16>
    %57 = vector.shape_cast %56 : vector<1x4x256xbf16> to vector<4x256xbf16>
    %cst_30 = arith.constant dense<0.000000e+00> : vector<32x256xf32>
    %58 = tpu.matmul %41, %57, %cst_30 {dimension_numbers = #tpu.dot_dimension_numbers<[1], [0], [0], [1], [0, 0, 1, 1], [], []>} : vector<32x4xbf16>, vector<4x256xbf16>, vector<32x256xf32> -> vector<32x256xf32>
    %59 = vector.broadcast %55 : vector<32x1xf32> to vector<32x256xf32>
    %60 = arith.addf %58, %59 : vector<32x256xf32>
    %c0_31 = arith.constant 0 : index
    %c0_32 = arith.constant 0 : index
    %c0_33 = arith.constant 0 : index
    %61 = vector.load %arg6[%c0_31, %c0_32, %c0_33] : memref<2x32x256xf32, #tpu.memory_space<vmem>>, vector<1x32x256xf32>
    %62 = vector.shape_cast %61 : vector<1x32x256xf32> to vector<32x256xf32>
    %63 = vector.shape_cast %60 : vector<32x256xf32> to vector<1x32x256xf32>
    tpu.vector_store %arg6[%c0_31, %c0_32, %c0_33], %63 {strides = array<i32>} : memref<2x32x256xf32, #tpu.memory_space<vmem>>, vector<1x32x256xf32>,
    %c1_34 = arith.constant 1 : index
    %c0_35 = arith.constant 0 : index
    %c0_36 = arith.constant 0 : index
    %64 = vector.load %arg1[%c1_34, %c0_35, %c0_36] : memref<2x4x256xbf16, #tpu.memory_space<vmem>>, vector<1x4x256xbf16>
    %65 = vector.shape_cast %64 : vector<1x4x256xbf16> to vector<4x256xbf16>
    %cst_37 = arith.constant dense<0.000000e+00> : vector<32x256xf32>
    %66 = tpu.matmul %41, %65, %cst_37 {dimension_numbers = #tpu.dot_dimension_numbers<[1], [0], [0], [1], [0, 0, 1, 1], [], []>} : vector<32x4xbf16>, vector<4x256xbf16>, vector<32x256xf32> -> vector<32x256xf32>
    %67 = vector.broadcast %55 : vector<32x1xf32> to vector<32x256xf32>
    %68 = arith.addf %66, %67 : vector<32x256xf32>
    %c1_38 = arith.constant 1 : index
    %c0_39 = arith.constant 0 : index
    %c0_40 = arith.constant 0 : index
    %69 = vector.load %arg6[%c1_38, %c0_39, %c0_40] : memref<2x32x256xf32, #tpu.memory_space<vmem>>, vector<1x32x256xf32>
    %70 = vector.shape_cast %69 : vector<1x32x256xf32> to vector<32x256xf32>
    %71 = vector.shape_cast %68 : vector<32x256xf32> to vector<1x32x256xf32>
    tpu.vector_store %arg6[%c1_38, %c0_39, %c0_40], %71 {strides = array<i32>} : memref<2x32x256xf32, #tpu.memory_space<vmem>>, vector<1x32x256xf32>,
    return
  }
  func.func @transform_0(%arg0: i32) -> (i32, i32, i32) {
    %c0_i32 = arith.constant 0 : i32
    %c0_i32_0 = arith.constant 0 : i32
    %c0_i32_1 = arith.constant 0 : i32
    %c0_i32_2 = arith.constant 0 : i32
    return %c0_i32, %c0_i32_0, %c0_i32_1 : i32, i32, i32
  }
  func.func @transform_1(%arg0: i32) -> (i32, i32) {
    %c0_i32 = arith.constant 0 : i32
    %c0_i32_0 = arith.constant 0 : i32
    %c0_i32_1 = arith.constant 0 : i32
    return %c0_i32, %c0_i32_0 : i32, i32
  }
  func.func @transform_2(%arg0: i32) -> (i32, i32) {
    %c0_i32 = arith.constant 0 : i32
    %c0_i32_0 = arith.constant 0 : i32
    %c0_i32_1 = arith.constant 0 : i32
    return %c0_i32, %c0_i32_0 : i32, i32
  }
  func.func @transform_3(%arg0: i32) -> (i32, i32, i32) {
    %c0_i32 = arith.constant 0 : i32
    %c0_i32_0 = arith.constant 0 : i32
    %c0_i32_1 = arith.constant 0 : i32
    %c0_i32_2 = arith.constant 0 : i32
    return %c0_i32, %c0_i32_0, %c0_i32_1 : i32, i32, i32
  }
  func.func @transform_4(%arg0: i32) -> (i32, i32, i32) {
    %c0_i32 = arith.constant 0 : i32
    %c0_i32_0 = arith.constant 0 : i32
    %c0_i32_1 = arith.constant 0 : i32
    %c0_i32_2 = arith.constant 0 : i32
    return %c0_i32, %c0_i32_0, %c0_i32_1 : i32, i32, i32
  }
  func.func @transform_5(%arg0: i32) -> (i32, i32, i32) {
    %c0_i32 = arith.constant 0 : i32
    %c0_i32_0 = arith.constant 0 : i32
    %c0_i32_1 = arith.constant 0 : i32
    %c0_i32_2 = arith.constant 0 : i32
    return %c0_i32, %c0_i32_0, %c0_i32_1 : i32, i32, i32
  }
}

</mosaic_0001>

<bundles_post_ra>
// kernel: tpu_custom_call.1
= control target key start
LH: loop header
LB: loop body
LE: loop exit
PB: predicated region body
PF: predicated region fallthrough
CT: control target
= control target key end

     0   :  { %vm27_vm0 = vcmask 1043456   ;;  %s564_s0 = inlined_call_operand.vmem [shape: bf16[2,4,256], index: 0, kind: input, shape index: {}]   ;;  %s565_s1 = inlined_call_operand.vmem [shape: f32[4,3], index: 1, kind: input, shape index: {}]   ;;  %s566_s2 = inlined_call_operand.vmem [shape: f32[1,3], index: 2, kind: input, shape index: {}]   ;;  %s567_s3 = inlined_call_operand.vmem [shape: bf16[3,32,4], index: 3, kind: input, shape index: {}]   ;;  %s568_s4 = inlined_call_operand.vmem [shape: f32[3,32,1], index: 4, kind: input, shape index: {}]   ;;  %s569_s5 = inlined_call_operand.hbm [shape: f32[2,32,256], index: 5, kind: output, shape index: {}]  }
   0x1   :  { %v22_v0 = vld [vmem:[%s564_s0] sm:$0xf] }
   0x2   :  { %v23_v1 = vunpack.c.l.bf16 %v22_v0 }
   0x3   :  { %10 = vsyncpa [#allocation3], 0  ;;  %v33_v6 = vld [vmem:[%s565_s1] sm:$0xf]  ;;  %vm35_vm1 = vcmask 19456   ;;  %v118_v23 = vlaneseq  ;;  %v452_v25 = vmov 0  }
   0x4   :  { %v25_v2 = vcombine.high %v23_v1, %v23_v1  ;;  %v28_v3 = vsel %vm27_vm0, %v23_v1, 0.0  ;;  %v44_v16 = vld [vmem:[%s566_s2] sm:$0x1]  ;;  %424 = vset.pattern.permute.xlu1 %v452_v25  ;;  %234 = vmatprep.mubr.bf16.mxu0 %v452_v25  ;;  %s453_s1 = smov 126   ;;  %s454_s2 = smov 127   ;;  %vm195_vm2 = vcmask 1041408  }
   0x5   :  { %v119_v24 = vshrl.u32 %v118_v23, 7  ;;  %312 = vmatprep.mubr.bf16.mxu1 %v452_v25  ;;  %425 = vset.pattern.permute.xlu0 %v452_v25  ;;  %v455_v29 = vmov 1983009808   ;;  %v366_v41 = vld [vmem:[%s568_s4 + $0x20] sm:$0xff]  ;;  %v367_v45 = vld [vmem:[%s568_s4 + $0x28] sm:$0xff]  ;;  %v368_v54 = vld [vmem:[%s568_s4 + $0x30] sm:$0xff] }
   0x6   :  { %v29_v4 = vsel %vm27_vm0, %v25_v2, 0.0  ;;  %v181_v30 = vunpack.c.l.s4 %v455_v29  ;;  %v378_v34 = vld.sshfl [vmem:[%s564_s0 + $0x4] sm:$0x33 pattern:$0x76325410]  ;;  %v371_v48 = vld [vmem:[%s568_s4 + $0x48] sm:$0xff] }
   0x7   :  { %v30_v5 = vadd.f32 %v29_v4, %v28_v3  ;;  %v120_v26 = vsub.s32 0, %v119_v24  ;;  %v273_v35 = vcombine.high %v378_v34, %v378_v34  ;;  %v275_v38 = vsel %vm195_vm2, %v378_v34, 0  ;;  %v114_v43 = vld [vmem:[%s568_s4] sm:$0xff]  ;;  %v115_v50 = vld [vmem:[%s568_s4 + $0x8] sm:$0xff]  ;;  %v372_v58 = vld [vmem:[%s568_s4 + $0x50] sm:$0xff] }
   0x8   :  { %v182_v31 = vunpack.c.0.s8 %v181_v30  ;;  %v370_v46 = vld [vmem:[%s568_s4 + $0x40] sm:$0xff]  ;;  %v116_v59 = vld [vmem:[%s568_s4 + $0x10] sm:$0xff]  ;;  %v369_v62 = vld [vmem:[%s568_s4 + $0x38] sm:$0xff]  ;;  %vm188_vm3 = vcmask 31744  }
   0x9   :  { %31 = vadd.xlane.f32.xlu0 %v30_v5  ;;  %379 = vmatprep.subr.msk.bf16.mxu1 %vm195_vm2, %v273_v35  ;;  %v373_v2 = vld [vmem:[%s568_s4 + $0x58] sm:$0xff] }
   0xa   :  { %v185_v32 = vsub.s32 %v182_v31, %v119_v24  ;;  %295 = vmatpush1.bf16.msra.mxu1 %v275_v38  ;;  %v117_v3 = vld [vmem:[%s568_s4 + $0x18] sm:$0xff] }
   0xc   :  { %v186_v33 = vrot.slane %v22_v0, %v185_v32 }
   0xe   :  { %v187_v36 = vcombine.high %v186_v33, %v186_v33  ;;  %v197_v37 = vsel %vm195_vm2, %v186_v33, 0  ;;  %v410_v33 = vld [vmem:[%s567_s3 + $0x28] sm:$0xff]  }
  0x10   :  { %374 = vmatprep.subr.msk.bf16.mxu0 %vm195_vm2, %v187_v36 }
  0x11   :  { %217 = vmatpush1.bf16.msra.mxu0 %v197_v37 }
  0x92   :  { %v32_v7 = vpop.xlane.xlu0 %31 }
  0x93   :  { %v34_v8 = vmul.f32 %v33_v6, %v32_v7 }
  0x95   :  { %v36_v9 = vsel %vm35_vm1, %v34_v8, 0.0 }
  0x96   :  { %v37_v10 = vrot.slane %v36_v9, 4 }
  0x98   :  { %v38_v11 = vadd.f32 %v37_v10, %v36_v9 }
  0x9a   :  { %v39_v12 = vrot.slane %v38_v11, 2 }
  0x9c   :  { %v40_v13 = vadd.f32 %v39_v12, %v38_v11  ;;  %v383_v11 = vld [vmem:[%s567_s3] sm:$0xff]   ;;  %v407_v12 = vld [vmem:[%s567_s3 + $0x10] sm:$0xff]  }
  0x9e   :  { %v41_v14 = vrot.slane %v40_v13, 1 }
  0xa0   :  { %v42_v15 = vadd.f32 %v41_v14, %v40_v13  ;;  %v408_v13 = vld [vmem:[%s567_s3 + $0x18] sm:$0xff]   ;;  %v384_v14 = vunpack.c.l.bf16 %v383_v11 }
  0xa2   :  { %v43_v17 = vmul.f32 0.00390625, %v42_v15  ;;  %v385_v15 = vunpack.c.h.bf16 %v383_v11 }
  0xa4   :  { %v45_v18 = vadd.f32 %v44_v16, %v43_v17  ;;  %v392_v16 = vunpack.c.l.bf16 %v407_v12  ;;  %v393_v17 = vunpack.c.h.bf16 %v407_v12 }
  0xa6   :  { %v46_v19 = vsub.f32 0.0, %v45_v18  ;;  %v409_v18 = vld [vmem:[%s567_s3 + $0x20] sm:$0xff]  }
  0xa7   :  { %v400_v24 = vunpack.c.l.bf16 %v409_v18 }
  0xa8   :  { %v47_v20 = vmul.f32 1.442695, %v46_v19 }
  0xaa   :  { %426 = vpow2.f32 %v47_v20  ;;  %v406_v20 = vld [vmem:[%s567_s3 + $0x8] sm:$0xff]   ;;  %s456_s3 = smov [#allocation2]  }
  0xab   :  { %v388_v31 = vunpack.c.l.bf16 %v406_v20  ;;  %v389_v32 = vunpack.c.h.bf16 %v406_v20  ;;  %s347_s10 = sshll.u32 %s456_s3, 4  ;;  %s348_s10 = int_to_ptr.vmem [resolvable:$true] %s347_s10 }
  0xac   :  { %s430_s11 = scalar_lea.vmem %s348_s10, 2048  ;;  %p435_p1 = scmp.lt.s32.totalorder %s348_s10, %s348_s10 }
  0xad   :  { %p431_p0 = scmp.ne.s32.totalorder %s348_s10, %s430_s11  ;;  %p436_p2 = scmp.lt.s32.totalorder %s430_s11, %s430_s11 }
  0xaf   :  { %p437_p3 = por %p436_p2, %p435_p1 }
  0xb1   :  { %p438_p4 = pnand %p437_p3, %p431_p0 }
  0xb7   :  { %v427_v21 = vpop.eup %426 }
  0xb8   :  { %v49_v22 = vadd.f32 1.0, %v427_v21  ;;  %v396_v21 = vunpack.c.l.bf16 %v408_v13 }
  0xba   :  { %428 = vrcp.f32 %v49_v22  ;;  %v397_v22 = vunpack.c.h.bf16 %v408_v13 }
  0xc7   :  { %v429_v27 = vpop.eup %428 }
  0xc8   :  { %99 = vrot.lane.b32.xlu1 %v429_v27, %s453_s1  ;;  %77 = vrot.lane.b32.xlu0 %v429_v27, %s454_s2  ;;  %411 = vpush %v429_v27  ;;  %v121_v28 = vrot.slane %v429_v27, %v120_v26  ;;  %v401_v26 = vunpack.c.h.bf16 %v409_v18 }
  0xca   :  { %v122_v47 = vmul.f32 %v121_v28, %v114_v43  ;;  %v123_v57 = vmul.f32 %v121_v28, %v115_v50  ;;  %v124_v1 = vmul.f32 %v121_v28, %v116_v59  ;;  %v125_v8 = vmul.f32 %v121_v28, %v117_v3 }
  0xcc   :  { %132 = vrot.lane.b32.xlu1 %v121_v28, %s454_s2 }
  0xd0   :  { %148 = vrot.lane.b32.xlu1 %v121_v28, %s453_s1 }
  0xf9   :  { %s412_s26 = spop %411 }
  0xfa   :  { %v62_v19 = vstv %s412_s26 }
  0xfb   :  { %v64_v27 = vmul.f32 %v384_v14, %v62_v19  ;;  %v65_v28 = vmul.f32 %v385_v15, %v62_v19  ;;  %v66_v43 = vmul.f32 %v388_v31, %v62_v19 }
 0x13a   :  { %v100_v39 = vpop.permute.xlu1 %99  ;;  %v78_v40 = vpop.permute.xlu0 %77 }
 0x13b   :  { %413 = vpush %v78_v40 }
 0x13c   :  { %415 = vpush %v100_v39 }
 0x13e   :  { %v133_v42 = vpop.permute.xlu1 %132 }
 0x13f   :  { %v135_v44 = vmul.f32 %v366_v41, %v133_v42  ;;  %v136_v51 = vmul.f32 %v367_v45, %v133_v42  ;;  %v137_v60 = vmul.f32 %v368_v54, %v133_v42  ;;  %v138_v4 = vmul.f32 %v369_v62, %v133_v42 }
 0x140   :  { %v404_v41 = vunpack.c.l.bf16 %v410_v33  ;;  %v405_v42 = vunpack.c.h.bf16 %v410_v33 }
 0x141   :  { %v139_v53 = vadd.f32 %v135_v44, %v122_v47  ;;  %v140_v61 = vadd.f32 %v136_v51, %v123_v57  ;;  %v141_v5 = vadd.f32 %v137_v60, %v124_v1  ;;  %v142_v9 = vadd.f32 %v138_v4, %v125_v8 }
 0x142   :  { %v149_v49 = vpop.permute.xlu1 %148  ;;  %v67_v44 = vmul.f32 %v389_v32, %v62_v19 }
 0x143   :  { %v151_v52 = vmul.f32 %v370_v46, %v149_v49  ;;  %v152_v55 = vmul.f32 %v371_v48, %v149_v49  ;;  %v153_v63 = vmul.f32 %v372_v58, %v149_v49  ;;  %v154_v6 = vmul.f32 %v373_v2, %v149_v49 }
 0x145   :  { %v155_v56 = vadd.f32 %v151_v52, %v139_v53  ;;  %v156_v0 = vadd.f32 %v152_v55, %v140_v61  ;;  %v157_v7 = vadd.f32 %v153_v63, %v141_v5  ;;  %v158_v10 = vadd.f32 %v154_v6, %v142_v9 }
 0x147   :  { %161 = vperm.xlu1 %424, %v155_v56  }
 0x14b   :  { %166 = vperm.xlu1 %424, %v156_v0  }
 0x14f   :  { %171 = vperm.xlu1 %424, %v157_v7  }
 0x153   :  { %176 = vperm.xlu1 %424, %v158_v10  }
 0x16c   :  { %s414_s6 = spop %413 }
 0x16d   :  { %v80_v23 = vstv %s414_s6  ;;  %s416_s7 = spop %415 }
 0x16e   :  { %v82_v29 = vmul.f32 %v392_v16, %v80_v23  ;;  %v83_v30 = vmul.f32 %v393_v17, %v80_v23  ;;  %v102_v34 = vstv %s416_s7  ;;  %v84_v37 = vmul.f32 %v396_v21, %v80_v23 }
 0x16f   :  { %v85_v38 = vmul.f32 %v397_v22, %v80_v23  ;;  %v104_v39 = vmul.f32 %v400_v24, %v102_v34  ;;  %v105_v40 = vmul.f32 %v401_v26, %v102_v34  ;;  %v106_v50 = vmul.f32 %v404_v41, %v102_v34 }
 0x170   :  { %v86_v35 = vadd.f32 %v82_v29, %v64_v27  ;;  %v87_v36 = vadd.f32 %v83_v30, %v65_v28  ;;  %v88_v47 = vadd.f32 %v84_v37, %v66_v43  ;;  %v107_v51 = vmul.f32 %v405_v42, %v102_v34 }
 0x171   :  { %v89_v48 = vadd.f32 %v85_v38, %v67_v44 }
 0x172   :  { %v108_v45 = vadd.f32 %v104_v39, %v86_v35  ;;  %v109_v46 = vadd.f32 %v105_v40, %v87_v36  ;;  %v110_v52 = vadd.f32 %v106_v50, %v88_v47 }
 0x173   :  { %v111_v53 = vadd.f32 %v107_v51, %v89_v48 }
 0x174   :  { %v112_v49 = vpack.c.bf16 %v109_v46, %v108_v45 }
 0x175   :  { %v113_v54 = vpack.c.bf16 %v111_v53, %v110_v52 }
 0x176   :  { %375 = vmatmul.mubr.msk.bf16.vlgmr.msra.gmra.mxu0 %vm188_vm3, %v112_v49  ;;  %380 = vmatmul.mubr.msk.bf16.vlgmr.msra.gmra.mxu1 %vm188_vm3, %v112_v49 }
 0x177   :  { %244 = vmatprep.mubr.bf16.mxu0 %v452_v25  ;;  %322 = vmatprep.mubr.bf16.mxu1 %v452_v25 }
 0x17e   :  { %376 = vmatmul.mubr.msk.bf16.gmra.mxu0 %vm188_vm3, %v113_v54  ;;  %381 = vmatmul.mubr.msk.bf16.gmra.mxu1 %vm188_vm3, %v113_v54 }
 0x1c2   :  { %v162_v55 = vpop.permute.xlu1 %161 }
 0x1c6   :  { %v167_v56 = vpop.permute.xlu1 %166 }
 0x1ca   :  { %v172_v25 = vpop.permute.xlu1 %171 }
 0x1ce   :  { %v177_v15 = vpop.permute.xlu1 %176 }
 0x236   :  { %v236_v57 = vpop.f32.mrf.mxu0  ;;  %v314_v58 = vpop.f32.mrf.mxu1 }
 0x237   :  { %v237_v59 = vadd.f32 %v236_v57, %v162_v55  ;;  %v315_v60 = vadd.f32 %v314_v58, %v162_v55 }
 0x238   :  { %v238_v61 = vpop.f32.mrf.mxu0  ;;  %v316_v62 = vpop.f32.mrf.mxu1 }
 0x239   :  { %255 = vst [vmem:[#allocation2] sm:$0xff] %v237_v59  ;;  %334 = vst [vmem:[#allocation2 + $0x40] sm:$0xff] %v315_v60  ;;  %v239_v63 = vadd.f32 %v238_v61, %v162_v55  ;;  %v317_v0 = vadd.f32 %v316_v62, %v162_v55 }
 0x23a   :  { %v240_v1 = vpop.f32.mrf.mxu0  ;;  %v318_v2 = vpop.f32.mrf.mxu1 }
 0x23b   :  { %256 = vst [vmem:[#allocation2 + $0x8] sm:$0xff] %v239_v63  ;;  %335 = vst [vmem:[#allocation2 + $0x48] sm:$0xff] %v317_v0  ;;  %v241_v3 = vadd.f32 %v240_v1, %v167_v56  ;;  %v319_v4 = vadd.f32 %v318_v2, %v167_v56 }
 0x23c   :  { %v242_v5 = vpop.f32.mrf.mxu0  ;;  %v320_v6 = vpop.f32.mrf.mxu1 }
 0x23d   :  { %257 = vst [vmem:[#allocation2 + $0x10] sm:$0xff] %v241_v3  ;;  %336 = vst [vmem:[#allocation2 + $0x50] sm:$0xff] %v319_v4  ;;  %v243_v7 = vadd.f32 %v242_v5, %v167_v56  ;;  %v321_v8 = vadd.f32 %v320_v6, %v167_v56 }
 0x23e   :  { %v246_v9 = vpop.f32.mrf.mxu0  ;;  %v324_v10 = vpop.f32.mrf.mxu1 }
 0x23f   :  { %258 = vst [vmem:[#allocation2 + $0x18] sm:$0xff] %v243_v7  ;;  %337 = vst [vmem:[#allocation2 + $0x58] sm:$0xff] %v321_v8  ;;  %v247_v11 = vadd.f32 %v246_v9, %v172_v25  ;;  %v325_v12 = vadd.f32 %v324_v10, %v172_v25 }
 0x240   :  { %v248_v13 = vpop.f32.mrf.mxu0  ;;  %v326_v14 = vpop.f32.mrf.mxu1 }
 0x241   :  { %259 = vst [vmem:[#allocation2 + $0x20] sm:$0xff] %v247_v11  ;;  %338 = vst [vmem:[#allocation2 + $0x60] sm:$0xff] %v325_v12  ;;  %v249_v16 = vadd.f32 %v248_v13, %v172_v25  ;;  %v327_v17 = vadd.f32 %v326_v14, %v172_v25 }
 0x242   :  { %v250_v18 = vpop.f32.mrf.mxu0  ;;  %v328_v19 = vpop.f32.mrf.mxu1 }
 0x243   :  { %260 = vst [vmem:[#allocation2 + $0x28] sm:$0xff] %v249_v16  ;;  %339 = vst [vmem:[#allocation2 + $0x68] sm:$0xff] %v327_v17  ;;  %v251_v20 = vadd.f32 %v250_v18, %v177_v15  ;;  %v329_v21 = vadd.f32 %v328_v19, %v177_v15 }
 0x244   :  { %v252_v22 = vpop.f32.mrf.mxu0  ;;  %v330_v23 = vpop.f32.mrf.mxu1 }
 0x245   :  { %261 = vst [vmem:[#allocation2 + $0x30] sm:$0xff] %v251_v20  ;;  %340 = vst [vmem:[#allocation2 + $0x70] sm:$0xff] %v329_v21  ;;  %v253_v24 = vadd.f32 %v252_v22, %v177_v15  ;;  %v331_v26 = vadd.f32 %v330_v23, %v177_v15 }
 0x247   :  { %262 = vst [vmem:[#allocation2 + $0x38] sm:$0xff] %v253_v24  ;;  %341 = vst [vmem:[#allocation2 + $0x78] sm:$0xff] %v331_v26 }
 0x248   :  { %441 = shalt.err (!%p438_p4)
}
 0x249   :  { %s457_s12 = smov 256   ;;  %s458_s13 = smov 16  }
 0x24a   :  { %353 = dma.vmem_to_hbm [thread:$0]  %s348_s10, 2048, %s569_s5, [#allocation3], %s457_s12, %s457_s12, %s458_s13  }
 0x24b   :  { %450 = dma.done.wait [#allocation3], 2048  }
 0x24c   :  { %451 = vsyncadd [#allocation3], 4294965248 }
 0x24d   :  { %357 = vsyncpa [#allocation3], 1 }

</bundles_post_ra>
